<compile_context>
chip_gen: v7x
topology: tpu7x:2x2x1
jax: 0.10.0
libtpu: 0.0.40
codegen_flags: <defaults>
</compile_context>

<pallas_src>
from typing import NamedTuple

import jax
import jax.numpy as jnp
from jax import lax
from jax.experimental import pallas as pl
from jax.experimental.pallas import tpu as pltpu


def _cdiv(a, b):
    return (a + b - 1) // b


def _round_up(x, m):
    return _cdiv(x, m) * m


def _param_tiles(N, K):
    """Batch-independent N/K tile sizes so the weight can be prepared once."""
    tk = min(2048, _round_up(K, 128))
    tn = min(1024, _round_up(N, 128))
    # v7x megacore heuristic: if N fits in a single tile, split it so the
    # "parallel" N grid axis has >= 2 steps (engages both TensorCores).
    if _cdiv(N, tn) == 1 and tn > 128:
        tn = _round_up(_cdiv(tn, 2), 128)
    return tn, tk


class ClassifierParams(NamedTuple):
    w_t: jax.Array    # (Kp, Np): transposed, padded, streaming-dtype weight
    b2d: jax.Array    # (1, Np): f32 bias row
    out_dim: int
    in_dim: int
    tn: int
    tk: int


def prepare_classifier_params(weight, bias, *, operand_dtype=jnp.bfloat16):
    """One-time parameter prep, hoisted out of the per-call hot path.

    weight: (out_dim, in_dim) PyTorch layout, bias: (out_dim,).
    Casts the weight to the HBM streaming dtype (bf16 by default), transposes
    once to (K, N) and zero-pads to tile multiples.
    """
    N, K = weight.shape
    assert bias.shape == (N,), "bias must be (output_dim,)"
    tn, tk = _param_tiles(N, K)
    Np, Kp = _round_up(N, tn), _round_up(K, tk)

    w_t = jnp.asarray(weight).astype(operand_dtype).T          # (K, N)
    if (Kp, Np) != (K, N):
        w_t = jnp.pad(w_t, ((0, Kp - K), (0, Np - N)))          # zero K/N pad

    b2d = jnp.asarray(bias).astype(jnp.float32).reshape(1, N)
    if Np != N:
        b2d = jnp.pad(b2d, ((0, 0), (0, Np - N)))

    return ClassifierParams(w_t=w_t, b2d=b2d, out_dim=N, in_dim=K, tn=tn, tk=tk)


def _make_linear_kernel(precision):
    def _kernel(x_ref, w_ref, b_ref, o_ref):
        # grid = (M//tm, N//tn, K//tk); K is last + "arbitrary" and the output
        # index_map ignores k -> output-stationary accumulation in VMEM.
        k = pl.program_id(2)
        part = jnp.dot(
            x_ref[...],                      # (tm, tk), streaming dtype
            w_ref[...],                      # (tk, tn), streaming dtype
            preferred_element_type=jnp.float32,
            precision=precision,
        )

        # Fold bias into the first K step: no zero-init pass, no finalize RMW.
        @pl.when(k == 0)
        def _first():
            o_ref[...] = part + b_ref[...]

        @pl.when(k > 0)
        def _accum():
            o_ref[...] += part

    return _kernel


def _vmem_limit_bytes(est_bytes):
    try:
        phys = int(getattr(pltpu.get_tpu_info(), "vmem_capacity_bytes", 64 << 20))
    except Exception:
        phys = 64 << 20                      # conservative: v7x per-core size
    cap = min(100 << 20, (phys * 3) // 4)    # ~48 MiB on v7x, ~96 MiB on v5e/v6e
    return int(min(cap, max(16 << 20, 2 * est_bytes)))


def classifier_forward(feature, params: ClassifierParams):
    """feature: (B, in_dim) -> (B, out_dim); matches nn.Linear(in_dim, out_dim)."""
    B, K = feature.shape
    assert K == params.in_dim, "feature inner dim must match weight inner dim"
    w_t, b2d, N, _, tn, tk = params
    Kp, Np = w_t.shape
    operand_dtype = w_t.dtype

    tm = min(1024, _round_up(B, 16))         # multiple of 16: bf16 sublane packing
    Mp = _round_up(B, tm)

    x = feature.astype(operand_dtype)        # only per-call cast (activations)
    if (Mp, Kp) != (B, K):
        x = jnp.pad(x, ((0, Mp - B), (0, Kp - K)))   # zero pad keeps K-sum exact

    grid = (Mp // tm, Np // tn, Kp // tk)

    isz = jnp.dtype(operand_dtype).itemsize
    est_vmem = 2 * (tm * tk * isz + tk * tn * isz + tn * 4) + 2 * tm * tn * 4

    precision = lax.Precision.HIGHEST if operand_dtype == jnp.float32 else None

    out = pl.pallas_call(
        _make_linear_kernel(precision),
        out_shape=jax.ShapeDtypeStruct((Mp, Np), jnp.float32),
        grid_spec=pltpu.PrefetchScalarGridSpec(
            num_scalar_prefetch=0,
            grid=grid,
            in_specs=[
                pl.BlockSpec((tm, tk), lambda i, j, k: (i, k)),   # activations
                pl.BlockSpec((tk, tn), lambda i, j, k: (k, j)),   # weight (K, N)
                pl.BlockSpec((1, tn), lambda i, j, k: (0, j)),    # bias row
            ],
            out_specs=pl.BlockSpec((tm, tn), lambda i, j, k: (i, j)),
        ),
        compiler_params=pltpu.CompilerParams(
            dimension_semantics=("parallel", "parallel", "arbitrary"),
            vmem_limit_bytes=_vmem_limit_bytes(est_vmem),
        ),
    )(x, w_t, b2d)

    if (Mp, Np) != (B, N):
        out = out[:B, :N]
    return out


if __name__ == "__main__":
    # Small shapes consistent with the module: Classifier(input_dim=256, output_dim=128)
    batch, input_dim, output_dim = 8, 256, 128

    key = jax.random.PRNGKey(0)
    k_x, k_w, k_b = jax.random.split(key, 3)

    feature = jax.random.normal(k_x, (batch, input_dim), dtype=jnp.float32)
    # Deterministic synthetic parameters (same shapes as nn.Linear(input_dim, output_dim))
    weight = jax.random.normal(k_w, (output_dim, input_dim), dtype=jnp.float32) * 0.02
    bias = jax.random.normal(k_b, (output_dim,), dtype=jnp.float32) * 0.01

    # 1) Production path: bf16 operand streaming, f32 accumulation, params prepared once.
    params_bf16 = prepare_classifier_params(weight, bias)           # hoisted, one-time
    out_fast = jax.block_until_ready(classifier_forward(feature, params_bf16))
    ref_bf16 = (
        jnp.dot(
            feature.astype(jnp.bfloat16),
            weight.astype(jnp.bfloat16).T,
            preferred_element_type=jnp.float32,
        )
        + bias
    )
    assert out_fast.shape == (batch, output_dim)
    assert jnp.allclose(out_fast, ref_bf16, atol=1e-2, rtol=1e-2), "bf16 path mismatch"

    # 2) Exact debug path: f32 operands, precision=HIGHEST, tight tolerance.
    params_f32 = prepare_classifier_params(weight, bias, operand_dtype=jnp.float32)
    out_f32 = jax.block_until_ready(classifier_forward(feature, params_f32))
    ref_f32 = jnp.dot(feature, weight.T, precision=lax.Precision.HIGHEST) + bias
    assert out_f32.shape == (batch, output_dim)
    assert jnp.allclose(out_f32, ref_f32, atol=1e-4, rtol=1e-4), "f32 path mismatch"

    print("KERNEL_OK")
</pallas_src>

<mosaic_0001>
module attributes {stable_mosaic.version = 11 : i64} {
  func.func @_kernel(%arg0: i32, %arg1: i32, %arg2: i32, %arg3: memref<16x256xbf16, #tpu.memory_space<vmem>>, %arg4: memref<256x128xbf16, #tpu.memory_space<vmem>>, %arg5: memref<1x128xf32, #tpu.memory_space<vmem>>, %arg6: memref<16x128xf32, #tpu.memory_space<vmem>>) attributes {dimension_semantics = [#tpu.dimension_semantics<parallel>, #tpu.dimension_semantics<parallel>, #tpu.dimension_semantics<arbitrary>], iteration_bounds = array<i64: 1, 1, 1>, scalar_prefetch = 0 : i64, scratch_operands = 0 : i64, tpu.core_type = #tpu.core_type<tc>, window_params = [{transform_indices = @transform_0, window_bounds = array<i64: 16, 256>}, {transform_indices = @transform_1, window_bounds = array<i64: 256, 128>}, {transform_indices = @transform_2, window_bounds = array<i64: 1, 128>}, {transform_indices = @transform_3, window_bounds = array<i64: 16, 128>}]} {
    %c0 = arith.constant 0 : index
    %c0_0 = arith.constant 0 : index
    %0 = vector.load %arg3[%c0, %c0_0] : memref<16x256xbf16, #tpu.memory_space<vmem>>, vector<16x256xbf16>
    %c0_1 = arith.constant 0 : index
    %c0_2 = arith.constant 0 : index
    %1 = vector.load %arg4[%c0_1, %c0_2] : memref<256x128xbf16, #tpu.memory_space<vmem>>, vector<256x128xbf16>
    %cst = arith.constant dense<0.000000e+00> : vector<16x128xf32>
    %2 = tpu.matmul %0, %1, %cst {dimension_numbers = #tpu.dot_dimension_numbers<[1], [0], [0], [1], [0, 0, 1, 1], [], []>} : vector<16x256xbf16>, vector<256x128xbf16>, vector<16x128xf32> -> vector<16x128xf32>
    %c0_i32 = arith.constant 0 : i32
    %3 = arith.cmpi eq, %arg2, %c0_i32 : i32
    %4 = arith.extui %3 : i1 to i32
    %c0_i32_3 = arith.constant 0 : i32
    %5 = arith.cmpi ne, %4, %c0_i32_3 : i32
    scf.if %5 {
      %c0_6 = arith.constant 0 : index
      %c0_7 = arith.constant 0 : index
      %9 = vector.load %arg5[%c0_6, %c0_7] : memref<1x128xf32, #tpu.memory_space<vmem>>, vector<1x128xf32>
      %10 = vector.broadcast %9 : vector<1x128xf32> to vector<16x128xf32>
      %11 = arith.addf %2, %10 : vector<16x128xf32>
      %c0_8 = arith.constant 0 : index
      %c0_9 = arith.constant 0 : index
      %12 = vector.load %arg6[%c0_8, %c0_9] : memref<16x128xf32, #tpu.memory_space<vmem>>, vector<16x128xf32>
      tpu.vector_store %arg6[%c0_8, %c0_9], %11 {strides = array<i32>} : memref<16x128xf32, #tpu.memory_space<vmem>>, vector<16x128xf32>,
    } else {
    }
    %c0_i32_4 = arith.constant 0 : i32
    %6 = arith.cmpi sgt, %arg2, %c0_i32_4 : i32
    %7 = arith.extui %6 : i1 to i32
    %c0_i32_5 = arith.constant 0 : i32
    %8 = arith.cmpi ne, %7, %c0_i32_5 : i32
    scf.if %8 {
      %c0_6 = arith.constant 0 : index
      %c0_7 = arith.constant 0 : index
      %9 = vector.load %arg6[%c0_6, %c0_7] : memref<16x128xf32, #tpu.memory_space<vmem>>, vector<16x128xf32>
      %10 = arith.addf %9, %2 : vector<16x128xf32>
      %c0_8 = arith.constant 0 : index
      %c0_9 = arith.constant 0 : index
      %11 = vector.load %arg6[%c0_8, %c0_9] : memref<16x128xf32, #tpu.memory_space<vmem>>, vector<16x128xf32>
      tpu.vector_store %arg6[%c0_8, %c0_9], %10 {strides = array<i32>} : memref<16x128xf32, #tpu.memory_space<vmem>>, vector<16x128xf32>,
    } else {
    }
    return
  }
  func.func @transform_0(%arg0: i32, %arg1: i32, %arg2: i32) -> (i32, i32) {
    %c0_i32 = arith.constant 0 : i32
    return %arg0, %arg2 : i32, i32
  }
  func.func @transform_1(%arg0: i32, %arg1: i32, %arg2: i32) -> (i32, i32) {
    %c0_i32 = arith.constant 0 : i32
    return %arg2, %arg1 : i32, i32
  }
  func.func @transform_2(%arg0: i32, %arg1: i32, %arg2: i32) -> (i32, i32) {
    %c0_i32 = arith.constant 0 : i32
    %c0_i32_0 = arith.constant 0 : i32
    return %c0_i32, %arg1 : i32, i32
  }
  func.func @transform_3(%arg0: i32, %arg1: i32, %arg2: i32) -> (i32, i32) {
    %c0_i32 = arith.constant 0 : i32
    return %arg0, %arg1 : i32, i32
  }
}

</mosaic_0001>

<bundles_post_ra>
// kernel: tpu_custom_call.1
= control target key start
LH: loop header
LB: loop body
LE: loop exit
PB: predicated region body
PF: predicated region fallthrough
CT: control target
= control target key end

     0   :  { %8 = vsyncpa [#allocation3], 0  ;;  %s479_s0 = inlined_call_operand.hbm [shape: bf16[16,256], index: 0, kind: input, shape index: {}]   ;;  %s480_s1 = inlined_call_operand.hbm [shape: bf16[256,128], index: 1, kind: input, shape index: {}]   ;;  %s481_s2 = inlined_call_operand.vmem [shape: f32[1,128], index: 2, kind: input, shape index: {}]   ;;  %s482_s3 = inlined_call_operand.hbm [shape: f32[16,128], index: 3, kind: output, shape index: {}]  }
   0x1   :  { %9 = vsyncpa [#allocation6], 0 }
   0x2   :  { %10 = vsyncpa [#allocation4], 0  ;;  %s407_s12 = smov [#allocation2]   ;;  %s335_s16 = scalar_lea.hbm %s479_s0, 256 }
   0x3   :  { %s16_s13 = sshll.u32 %s407_s12, 4  ;;  %p336_p0 = scmp.ne.s32.totalorder %s479_s0, %s335_s16  ;;  %s17_s13 = int_to_ptr.vmem [resolvable:$true] %s16_s13 }
   0x4   :  { %p339_p1 = scmp.lt.u32.totalorder %s335_s16, %s479_s0 }
   0x6   :  { %p341_p2 = pnand %p339_p1, %p336_p0 }
   0x8   :  { %344 = shalt.err (!%p341_p2)
}
   0x9   :  { %s345_s21 = scalar_lea.vmem %s17_s13, 256  ;;  %p350_p4 = scmp.lt.s32.totalorder %s17_s13, %s17_s13 }
   0xa   :  { %p346_p3 = scmp.ne.s32.totalorder %s17_s13, %s345_s21  ;;  %p351_p5 = scmp.lt.s32.totalorder %s345_s21, %s345_s21 }
   0xc   :  { %p352_p6 = por %p351_p5, %p350_p4 }
   0xe   :  { %p353_p7 = pnand %p352_p6, %p346_p3 }
  0x10   :  { %356 = shalt.err (!%p353_p7)
}
  0x11   :  { %s408_s22 = smov 128   ;;  %s409_s23 = smov 8  }
  0x12   :  { %22 = dma.hbm_to_vmem [thread:$0]  %s479_s0, 256, %s17_s13, [#allocation3], %s408_s22, %s408_s22, %s409_s23  }
  0x13   :  { %s410_s26 = smov [#allocation5]   ;;  %s357_s30 = scalar_lea.hbm %s480_s1, 2048 }
  0x14   :  { %s28_s27 = sshll.u32 %s410_s26, 4  ;;  %p358_p8 = scmp.ne.s32.totalorder %s480_s1, %s357_s30  ;;  %s29_s27 = int_to_ptr.vmem [resolvable:$true] %s28_s27 }
  0x15   :  { %p361_p9 = scmp.lt.u32.totalorder %s357_s30, %s480_s1 }
  0x17   :  { %p363_p10 = pnand %p361_p9, %p358_p8 }
  0x19   :  { %366 = shalt.err (!%p363_p10)
}
  0x1a   :  { %s367_s8 = scalar_lea.vmem %s29_s27, 2048  ;;  %p372_p12 = scmp.lt.s32.totalorder %s29_s27, %s29_s27 }
  0x1b   :  { %p368_p11 = scmp.ne.s32.totalorder %s29_s27, %s367_s8  ;;  %p373_p13 = scmp.lt.s32.totalorder %s367_s8, %s367_s8 }
  0x1d   :  { %p374_p0 = por %p373_p13, %p372_p12 }
  0x1f   :  { %p375_p1 = pnand %p374_p0, %p368_p11 }
  0x21   :  { %378 = shalt.err (!%p375_p1)
}
  0x22   :  { %s411_s0 = smov 64   ;;  %s412_s9 = smov 4  }
  0x23   :  { %34 = dma.hbm_to_vmem [thread:$0]  %s480_s1, 2048, %s29_s27, [#allocation6], %s411_s0, %s411_s0, %s412_s9  }
  0x24   :  { %401 = dma.done.wait [#allocation3], 256  }
  0x25   :  { %402 = vsyncadd [#allocation3], 4294967040 }
  0x26   :  { %403 = dma.done.wait [#allocation6], 2048  }
  0x27   :  { %404 = vsyncadd [#allocation6], 4294965248  ;;  %v316_v0 = vld [vmem:[#allocation5 + $0x40] sm:$0xff]   ;;  %v318_v2 = vld [vmem:[#allocation5 + $0x48] sm:$0xff]   ;;  %s413_s13 = smov [#allocation7]  }
  0x28   :  { %v317_v1 = vld [vmem:[#allocation5] sm:$0xff]   ;;  %287 = vmatprep.subr.bf16.mxu0 %v316_v0  ;;  %v319_v3 = vld [vmem:[#allocation5 + $0x8] sm:$0xff]   ;;  %v320_v4 = vld [vmem:[#allocation5 + $0x50] sm:$0xff]   ;;  %s255_s14 = sshll.u32 %s413_s13, 4  ;;  %s256_s14 = int_to_ptr.vmem [resolvable:$true] %s255_s14 }
  0x29   :  { %288 = vmatpush3.bf16.msra.mxu0 %v317_v1  ;;  %v321_v5 = vld [vmem:[#allocation5 + $0x10] sm:$0xff]   ;;  %v322_v6 = vld [vmem:[#allocation5 + $0x58] sm:$0xff]   ;;  %v324_v8 = vld [vmem:[#allocation5 + $0x60] sm:$0xff]   ;;  %s379_s15 = scalar_lea.vmem %s256_s14, 256  ;;  %p384_p3 = scmp.lt.s32.totalorder %s256_s14, %s256_s14 }
  0x2a   :  { %289 = vmatprep.subr.bf16.mxu0 %v318_v2  ;;  %v323_v7 = vld [vmem:[#allocation5 + $0x18] sm:$0xff]   ;;  %v325_v9 = vld [vmem:[#allocation5 + $0x20] sm:$0xff]   ;;  %v326_v10 = vld [vmem:[#allocation5 + $0x68] sm:$0xff]   ;;  %p380_p2 = scmp.ne.s32.totalorder %s256_s14, %s379_s15  ;;  %p385_p4 = scmp.lt.s32.totalorder %s379_s15, %s379_s15 }
  0x2b   :  { %v334_v11 = vld [vmem:[#allocation2 + $0x4] ss:$8 sps:$4 sm:$0xff]   ;;  %v327_v12 = vld [vmem:[#allocation5 + $0x28] sm:$0xff]   ;;  %v332_v17 = vld [vmem:[#allocation2] ss:$8 sps:$4 sm:$0xff]  }
  0x2c   :  { %216 = vmatprep.mubr.bf16.mxu0 %v334_v11  ;;  %v328_v13 = vld [vmem:[#allocation5 + $0x70] sm:$0xff]   ;;  %v330_v15 = vld [vmem:[#allocation5 + $0x78] sm:$0xff]   ;;  %p386_p5 = por %p385_p4, %p384_p3 }
  0x2d   :  { %290 = vmatpush3.bf16.msra.mxu0 %v319_v3  ;;  %v329_v14 = vld [vmem:[#allocation5 + $0x30] sm:$0xff]   ;;  %v331_v16 = vld [vmem:[#allocation5 + $0x38] sm:$0xff]  }
  0x2e   :  { %291 = vmatprep.subr.bf16.mxu0 %v320_v4  ;;  %v286_v20 = vld [vmem:[%s481_s2] ss:$0 sm:$0xff]  ;;  %p387_p6 = pnand %p386_p5, %p380_p2 }
  0x31   :  { %292 = vmatpush3.bf16.msra.mxu0 %v321_v5 }
  0x32   :  { %293 = vmatprep.subr.bf16.mxu0 %v322_v6 }
  0x35   :  { %294 = vmatpush3.bf16.msra.mxu0 %v323_v7 }
  0x36   :  { %295 = vmatprep.subr.bf16.mxu0 %v324_v8 }
  0x39   :  { %296 = vmatpush3.bf16.msra.mxu0 %v325_v9 }
  0x3a   :  { %297 = vmatprep.subr.bf16.mxu0 %v326_v10 }
  0x3d   :  { %298 = vmatpush3.bf16.msra.mxu0 %v327_v12 }
  0x3e   :  { %299 = vmatprep.subr.bf16.mxu0 %v328_v13 }
  0x41   :  { %300 = vmatpush3.bf16.msra.mxu0 %v329_v14 }
  0x42   :  { %301 = vmatprep.subr.bf16.mxu0 %v330_v15 }
  0x45   :  { %302 = vmatpush3.bf16.msra.mxu0 %v331_v16 }
  0x48   :  { %217 = vmatmul.mubr.bf16.vlgmr.msra.gmra.mrb[0].mxu0 %v332_v17 }
 0x11b   :  { %v303_v18 = vpop.f32.mrb[0].mxu0 }
 0x11c   :  { %v304_v19 = vpop.f32.mrb[1].mxu0 }
 0x11d   :  { %v305_v21 = vadd.f32 %v304_v19, %v303_v18  ;;  %v306_v22 = vpop.f32.mrb[2].mxu0 }
 0x11e   :  { %v307_v23 = vpop.f32.mrb[3].mxu0 }
 0x11f   :  { %v236_v24 = vadd.f32 %v305_v21, %v286_v20  ;;  %v308_v25 = vadd.f32 %v307_v23, %v306_v22 }
 0x121   :  { %238 = vst [vmem:[#allocation7] sm:$0xff] %v236_v24  ;;  %v237_v26 = vadd.f32 %v308_v25, %v286_v20 }
 0x123   :  { %239 = vst [vmem:[#allocation7 + $0x8] sm:$0xff] %v237_v26 }
 0x124   :  { %390 = shalt.err (!%p387_p6)
}
 0x125   :  { %s391_s17 = scalar_lea.hbm %s482_s3, 256 }
 0x126   :  { %p392_p7 = scmp.ne.s32.totalorder %s482_s3, %s391_s17  ;;  %p395_p8 = scmp.lt.u32.totalorder %s391_s17, %s482_s3 }
 0x128   :  { %p397_p9 = pnand %p395_p8, %p392_p7 }
 0x12a   :  { %400 = shalt.err (!%p397_p9)
}
 0x12b   :  { %261 = dma.vmem_to_hbm [thread:$0]  %s256_s14, 256, %s482_s3, [#allocation4], %s408_s22, %s408_s22, %s409_s23  }
 0x12c   :  { %405 = dma.done.wait [#allocation4], 256  }
 0x12d   :  { %406 = vsyncadd [#allocation4], 4294967040 }
 0x12e   :  { %265 = vsyncpa [#allocation3], 1 }
 0x12f   :  { %266 = vsyncpa [#allocation6], 1 }
 0x130   :  { %267 = vsyncpa [#allocation4], 1 }

</bundles_post_ra>
